<compile_context>
chip_gen: v7x
topology: tpu7x:2x2x1
jax: 0.10.0
libtpu: 0.0.40
codegen_flags: <defaults>
</compile_context>

<pallas_src>
import functools

import jax
import jax.numpy as jnp
from jax.experimental import pallas as pl
from jax.experimental.pallas import tpu as pltpu


# ----------------------------------------------------------------------------
# Kernel body
# ----------------------------------------------------------------------------
def _cascade_kernel(q_ref, k_ref, v_ref,
                    out_ref, qk_ref, post_ref,
                    prev_ref, *, scale, tiles_per_group, recip_approx):
    """One grid step == (batch b, q-group g, head h, query tile t).

    Ref shapes (batch & head squeezed):
      q_ref/out_ref : (tq, d)     k_ref/v_ref : (n, d)
      qk_ref/post_ref: (tq, n)    prev_ref (scratch): (n_qtiles, tq, d)
    """
    h = pl.program_id(2)
    qi = pl.program_id(1) * tiles_per_group + pl.program_id(3)

    # First head: nothing to cascade -> zero this q-tile's carry.
    @pl.when(h == 0)
    def _():
        prev_ref[qi] = jnp.zeros(prev_ref.shape[1:], prev_ref.dtype)

    # Cascade add in the activation dtype (matches the PyTorch module) and
    # fold the softmax scale into q (O(tq*d) multiplies instead of O(tq*n)).
    q = (q_ref[...] + prev_ref[qi]) * scale                      # (tq, d)

    # dots = q @ k^T -- MXU operands stay in the input dtype, f32 accumulate.
    dots = jax.lax.dot_general(
        q, k_ref[...],
        dimension_numbers=(((1,), (1,)), ((), ())),
        preferred_element_type=jnp.float32)                      # (tq, n) f32

    # qk_similarities (== pre_softmax_attn here: no mask/bias): write once.
    qk_ref[...] = dots.astype(qk_ref.dtype)

    # softmax in float32 (matches partial(F.softmax, dtype=torch.float32)).
    m = jnp.max(dots, axis=-1, keepdims=True)
    e = jnp.exp(dots - m)
    denom = jnp.sum(e, axis=-1, keepdims=True)
    attn = e * pl.reciprocal(denom, approx=recip_approx)         # (tq, n) f32

    # Single cast back to the activation dtype (PyTorch: attn = attn.type(dtype)),
    # reused for both the post_softmax_attn writeback and the attn@v matmul.
    attn_act = attn.astype(v_ref.dtype)
    if post_ref.dtype == v_ref.dtype:
        post_ref[...] = attn_act
    else:
        post_ref[...] = attn.astype(post_ref.dtype)

    out = jax.lax.dot_general(
        attn_act, v_ref[...],
        dimension_numbers=(((1,), (0,)), ((), ())),
        preferred_element_type=jnp.float32)                      # (tq, d) f32

    out_cast = out.astype(out_ref.dtype)
    out_ref[...] = out_cast
    prev_ref[qi] = out_cast                                      # carry to head h+1


# ----------------------------------------------------------------------------
# Tile selection (generation / dtype aware)
# ----------------------------------------------------------------------------
_SUBLANE_PACK = {1: 32, 2: 16, 4: 8, 8: 8}


def _vmem_bytes(tq, n, d, act_bytes, map_bytes):
    """Rough VMEM footprint for one grid step (double-buffered pipeline)."""
    n_qt = -(-n // tq)
    blocks = 2 * (2 * tq * d * act_bytes        # q + out blocks
                  + 2 * n * d * act_bytes       # k + v blocks (head-resident)
                  + 2 * tq * n * map_bytes)     # qk + post blocks
    temps = 3 * tq * n * 4                      # f32 dots / exp / attn live values
    scratch = n_qt * tq * d * act_bytes         # prev-head carry
    return blocks + temps + scratch


def _choose_tq(n, d, act_bytes, map_bytes, budget, max_tq=512):
    """Largest q-tile (multiple of the dtype sublane pack) fitting the budget.

    Prefers divisors of n (no ragged tail); otherwise the caller uses a
    cdiv grid and Pallas masks the last (overhanging) tile.
    """
    sub = _SUBLANE_PACK.get(act_bytes, 8)
    if n <= max(max_tq, sub) and _vmem_bytes(n, n, d, act_bytes, map_bytes) <= budget:
        return n                                # single tile: block dim == array dim
    top = max(sub, (min(max_tq, n) // sub) * sub)
    fitting = None
    t = top
    while t >= sub:
        if _vmem_bytes(t, n, d, act_bytes, map_bytes) <= budget:
            if fitting is None:
                fitting = t                     # largest fitting tile (cdiv grid)
            if n % t == 0:
                return t                        # prefer a clean divisor of n
        t -= sub
    return fitting if fitting is not None else sub


def _vmem_budget_bytes():
    """~70% of physical VMEM; conservative v7x (64 MiB) fallback if unknown."""
    try:
        cap = pltpu.get_tpu_info().vmem_capacity_bytes
    except Exception:
        cap = 64 * 1024 * 1024
    return int(cap * 0.7)


# ----------------------------------------------------------------------------
# Wrapper
# ----------------------------------------------------------------------------
def cascading_heads(q, k, v, *, attn_map_dtype=None, max_tq=512):
    """Pallas implementation of CascadingHeads(Attend()).forward(q, k, v).

    attn_map_dtype: dtype for the (b,h,n,n) attention-map outputs
      (qk_similarities / post_softmax_attn).  Default None keeps the module's
      semantics (activation dtype).  Passing jnp.bfloat16 when q is f32 halves
      the dominant HBM writeback (~2x end-to-end on f32 inputs).
    """
    b, h, n, d = q.shape
    assert k.shape == (b, h, n, d) and v.shape == (b, h, n, d)

    act_dtype = jnp.dtype(q.dtype)
    map_dtype = jnp.dtype(attn_map_dtype) if attn_map_dtype is not None else act_dtype
    act_bytes = act_dtype.itemsize
    map_bytes = map_dtype.itemsize

    budget = _vmem_budget_bytes()
    tq = _choose_tq(n, d, act_bytes, map_bytes, budget, max_tq=max_tq)
    n_qt = -(-n // tq)                      # cdiv: ragged last tile is masked by Pallas

    # Megacore: if batch gives no parallelism, split q-tiles into 2 independent
    # groups (cascade only couples heads for the same query rows).
    groups = 2 if (b == 1 and n_qt >= 2 and n_qt % 2 == 0) else 1
    tpg = n_qt // groups

    scale = d ** -0.5
    recip_approx = bool(act_dtype != jnp.dtype(jnp.float32))

    kernel = functools.partial(_cascade_kernel, scale=scale,
                               tiles_per_group=tpg, recip_approx=recip_approx)

    # Batch & head dims squeezed (None) -> kernel sees 2-D tiles.
    q_spec = pl.BlockSpec((None, None, tq, d),
                          lambda bi, gi, hi, ti: (bi, hi, gi * tpg + ti, 0))
    kv_spec = pl.BlockSpec((None, None, n, d),
                           lambda bi, gi, hi, ti: (bi, hi, 0, 0))
    out_spec = pl.BlockSpec((None, None, tq, d),
                            lambda bi, gi, hi, ti: (bi, hi, gi * tpg + ti, 0))
    attn_spec = pl.BlockSpec((None, None, tq, n),
                             lambda bi, gi, hi, ti: (bi, hi, gi * tpg + ti, 0))

    grid_spec = pltpu.PrefetchScalarGridSpec(
        num_scalar_prefetch=0,
        grid=(b, groups, h, tpg),
        in_specs=[q_spec, kv_spec, kv_spec],
        out_specs=[out_spec, attn_spec, attn_spec],
        scratch_shapes=[pltpu.VMEM((n_qt, tq, d), act_dtype)],   # prev head output
    )

    out_shapes = (
        jax.ShapeDtypeStruct((b, h, n, d), act_dtype),   # all_outs
        jax.ShapeDtypeStruct((b, h, n, n), map_dtype),   # qk_similarities
        jax.ShapeDtypeStruct((b, h, n, n), map_dtype),   # post_softmax_attn
    )

    vmem_limit = int(min(budget,
                         max(2 * _vmem_bytes(tq, n, d, act_bytes, map_bytes),
                             32 * 1024 * 1024)))

    all_outs, qk_similarities, post_softmax_attn = pl.pallas_call(
        kernel,
        grid_spec=grid_spec,
        out_shape=out_shapes,
        compiler_params=pltpu.CompilerParams(
            # batch / q-group independent (megacore); head carries the cascade;
            # q-tile shares the per-core prev scratch -> arbitrary.
            dimension_semantics=("parallel", "parallel", "arbitrary", "arbitrary"),
            vmem_limit_bytes=vmem_limit),
    )(q, k, v)

    # With mask=None / attn_bias=None, pre_softmax_attn == qk_similarities.
    # Alias it to preserve the Intermediates API without writing it twice.
    pre_softmax_attn = qk_similarities
    return all_outs, qk_similarities, pre_softmax_attn, post_softmax_attn


# ----------------------------------------------------------------------------
# Pure-JAX reference mirroring the PyTorch module
# ----------------------------------------------------------------------------
def cascading_heads_ref(q, k, v):
    b, h, n, d = q.shape
    scale = d ** -0.5
    outs, qks, posts = [], [], []
    prev = jnp.zeros((b, n, d), q.dtype)
    for i in range(h):
        qi = q[:, i] + prev
        dots = (jnp.einsum('bid,bjd->bij', qi, k[:, i]) * scale).astype(q.dtype)
        attn = jax.nn.softmax(dots.astype(jnp.float32), axis=-1).astype(q.dtype)
        o = jnp.einsum('bij,bjd->bid', attn, v[:, i])
        prev = o
        outs.append(o)
        qks.append(dots)
        posts.append(attn)
    stack = lambda xs: jnp.stack(xs, axis=1)
    qk = stack(qks)
    return stack(outs), qk, qk, stack(posts)


if __name__ == "__main__":
    key = jax.random.PRNGKey(0)
    names = ("all_outs", "qk_similarities", "pre_softmax_attn", "post_softmax_attn")

    # Test 1: small module-consistent shapes (single q-tile path).
    kq, kk, kv = jax.random.split(key, 3)
    b, h, n, d = 2, 4, 8, 32
    q = jax.random.normal(kq, (b, h, n, d), dtype=jnp.float32)
    k = jax.random.normal(kk, (b, h, n, d), dtype=jnp.float32)
    v = jax.random.normal(kv, (b, h, n, d), dtype=jnp.float32)

    outs = jax.block_until_ready(cascading_heads(q, k, v))
    refs = cascading_heads_ref(q, k, v)
    for name, got, want in zip(names, outs, refs):
        assert got.shape == want.shape, (name, got.shape, want.shape)
        assert jnp.allclose(got, want, atol=2e-5, rtol=2e-5), name

    # Test 2: exercise q-tiling + the q-group megacore split (batch == 1).
    kq2, kk2, kv2 = jax.random.split(jax.random.PRNGKey(1), 3)
    b2, h2, n2, d2 = 1, 3, 256, 32
    q2 = jax.random.normal(kq2, (b2, h2, n2, d2), dtype=jnp.float32)
    k2 = jax.random.normal(kk2, (b2, h2, n2, d2), dtype=jnp.float32)
    v2 = jax.random.normal(kv2, (b2, h2, n2, d2), dtype=jnp.float32)

    outs2 = jax.block_until_ready(cascading_heads(q2, k2, v2, max_tq=64))
    refs2 = cascading_heads_ref(q2, k2, v2)
    for name, got, want in zip(names, outs2, refs2):
        assert got.shape == want.shape, (name, got.shape, want.shape)
        assert jnp.allclose(got, want, atol=1e-4, rtol=1e-4), name

    print("KERNEL_OK")
</pallas_src>

<mosaic_0001>
module attributes {stable_mosaic.version = 11 : i64} {
  func.func @_cascade_kernel(%arg0: i32, %arg1: i32, %arg2: i32, %arg3: i32, %arg4: memref<1x1x8x32xf32, #tpu.memory_space<vmem>>, %arg5: memref<1x1x8x32xf32, #tpu.memory_space<vmem>>, %arg6: memref<1x1x8x32xf32, #tpu.memory_space<vmem>>, %arg7: memref<1x1x8x32xf32, #tpu.memory_space<vmem>>, %arg8: memref<1x1x8x8xf32, #tpu.memory_space<vmem>>, %arg9: memref<1x1x8x8xf32, #tpu.memory_space<vmem>>, %arg10: memref<1x8x32xf32, #tpu.memory_space<vmem>>) attributes {dimension_semantics = [#tpu.dimension_semantics<parallel>, #tpu.dimension_semantics<parallel>, #tpu.dimension_semantics<arbitrary>, #tpu.dimension_semantics<arbitrary>], iteration_bounds = array<i64: 2, 1, 4, 1>, scalar_prefetch = 0 : i64, scratch_operands = 1 : i64, tpu.core_type = #tpu.core_type<tc>, window_params = [{transform_indices = @transform_0, window_bounds = array<i64: 1, 1, 8, 32>}, {transform_indices = @transform_1, window_bounds = array<i64: 1, 1, 8, 32>}, {transform_indices = @transform_2, window_bounds = array<i64: 1, 1, 8, 32>}, {transform_indices = @transform_3, window_bounds = array<i64: 1, 1, 8, 32>}, {transform_indices = @transform_4, window_bounds = array<i64: 1, 1, 8, 8>}, {transform_indices = @transform_5, window_bounds = array<i64: 1, 1, 8, 8>}]} {
    %c1_i32 = arith.constant 1 : i32
    %0 = arith.muli %arg1, %c1_i32 : i32
    %1 = arith.addi %0, %arg3 : i32
    %c0_i32 = arith.constant 0 : i32
    %2 = arith.cmpi eq, %arg2, %c0_i32 : i32
    %3 = arith.extui %2 : i1 to i32
    %c0_i32_0 = arith.constant 0 : i32
    %4 = arith.cmpi ne, %3, %c0_i32_0 : i32
    scf.if %4 {
      %cst_32 = arith.constant 0.000000e+00 : f32
      %42 = vector.broadcast %cst_32 : f32 to vector<8x32xf32>
      %43 = arith.index_cast %1 : i32 to index
      %c0_33 = arith.constant 0 : index
      %c0_34 = arith.constant 0 : index
      %44 = vector.load %arg10[%43, %c0_33, %c0_34] : memref<1x8x32xf32, #tpu.memory_space<vmem>>, vector<1x8x32xf32>
      %45 = vector.shape_cast %44 : vector<1x8x32xf32> to vector<8x32xf32>
      %46 = vector.shape_cast %42 : vector<8x32xf32> to vector<1x8x32xf32>
      tpu.vector_store %arg10[%43, %c0_33, %c0_34], %46 {strides = array<i32>} : memref<1x8x32xf32, #tpu.memory_space<vmem>>, vector<1x8x32xf32>,
    } else {
    }
    %c0 = arith.constant 0 : index
    %c0_1 = arith.constant 0 : index
    %c0_2 = arith.constant 0 : index
    %c0_3 = arith.constant 0 : index
    %5 = vector.load %arg4[%c0, %c0_1, %c0_2, %c0_3] : memref<1x1x8x32xf32, #tpu.memory_space<vmem>>, vector<1x1x8x32xf32>
    %6 = vector.shape_cast %5 : vector<1x1x8x32xf32> to vector<8x32xf32>
    %7 = arith.index_cast %1 : i32 to index
    %c0_4 = arith.constant 0 : index
    %c0_5 = arith.constant 0 : index
    %8 = vector.load %arg10[%7, %c0_4, %c0_5] : memref<1x8x32xf32, #tpu.memory_space<vmem>>, vector<1x8x32xf32>
    %9 = vector.shape_cast %8 : vector<1x8x32xf32> to vector<8x32xf32>
    %10 = arith.addf %6, %9 : vector<8x32xf32>
    %cst = arith.constant 0.176776692 : f32
    %11 = vector.broadcast %cst : f32 to vector<8x32xf32>
    %12 = arith.mulf %10, %11 : vector<8x32xf32>
    %c0_6 = arith.constant 0 : index
    %c0_7 = arith.constant 0 : index
    %c0_8 = arith.constant 0 : index
    %c0_9 = arith.constant 0 : index
    %13 = vector.load %arg5[%c0_6, %c0_7, %c0_8, %c0_9] : memref<1x1x8x32xf32, #tpu.memory_space<vmem>>, vector<1x1x8x32xf32>
    %14 = vector.shape_cast %13 : vector<1x1x8x32xf32> to vector<8x32xf32>
    %cst_10 = arith.constant dense<0.000000e+00> : vector<8x8xf32>
    %15 = tpu.matmul %12, %14, %cst_10 {dimension_numbers = #tpu.dot_dimension_numbers<[1], [1], [0], [0], [0, 0, 1, 0], [], []>} : vector<8x32xf32>, vector<8x32xf32>, vector<8x8xf32> -> vector<8x8xf32>
    %c0_11 = arith.constant 0 : index
    %c0_12 = arith.constant 0 : index
    %c0_13 = arith.constant 0 : index
    %c0_14 = arith.constant 0 : index
    %16 = vector.load %arg8[%c0_11, %c0_12, %c0_13, %c0_14] : memref<1x1x8x8xf32, #tpu.memory_space<vmem>>, vector<1x1x8x8xf32>
    %17 = vector.shape_cast %16 : vector<1x1x8x8xf32> to vector<8x8xf32>
    %18 = vector.shape_cast %15 : vector<8x8xf32> to vector<1x1x8x8xf32>
    tpu.vector_store %arg8[%c0_11, %c0_12, %c0_13, %c0_14], %18 {strides = array<i32>} : memref<1x1x8x8xf32, #tpu.memory_space<vmem>>, vector<1x1x8x8xf32>,
    %cst_15 = arith.constant dense<0xFF800000> : vector<8xf32>
    %19 = vector.multi_reduction <maximumf>, %15, %cst_15 [1] : vector<8x8xf32> to vector<8xf32>
    %20 = vector.shape_cast %19 : vector<8xf32> to vector<8x1xf32>
    %21 = vector.broadcast %20 : vector<8x1xf32> to vector<8x8xf32>
    %22 = arith.subf %15, %21 : vector<8x8xf32>
    %23 = math.exp %22 : vector<8x8xf32>
    %cst_16 = arith.constant dense<0.000000e+00> : vector<8xf32>
    %24 = vector.multi_reduction <add>, %23, %cst_16 [1] : vector<8x8xf32> to vector<8xf32>
    %25 = vector.shape_cast %24 : vector<8xf32> to vector<8x1xf32>
    %26 = tpu.reciprocal %25 : vector<8x1xf32> -> vector<8x1xf32>
    %27 = vector.broadcast %26 : vector<8x1xf32> to vector<8x8xf32>
    %28 = arith.mulf %23, %27 : vector<8x8xf32>
    %c0_17 = arith.constant 0 : index
    %c0_18 = arith.constant 0 : index
    %c0_19 = arith.constant 0 : index
    %c0_20 = arith.constant 0 : index
    %29 = vector.load %arg9[%c0_17, %c0_18, %c0_19, %c0_20] : memref<1x1x8x8xf32, #tpu.memory_space<vmem>>, vector<1x1x8x8xf32>
    %30 = vector.shape_cast %29 : vector<1x1x8x8xf32> to vector<8x8xf32>
    %31 = vector.shape_cast %28 : vector<8x8xf32> to vector<1x1x8x8xf32>
    tpu.vector_store %arg9[%c0_17, %c0_18, %c0_19, %c0_20], %31 {strides = array<i32>} : memref<1x1x8x8xf32, #tpu.memory_space<vmem>>, vector<1x1x8x8xf32>,
    %c0_21 = arith.constant 0 : index
    %c0_22 = arith.constant 0 : index
    %c0_23 = arith.constant 0 : index
    %c0_24 = arith.constant 0 : index
    %32 = vector.load %arg6[%c0_21, %c0_22, %c0_23, %c0_24] : memref<1x1x8x32xf32, #tpu.memory_space<vmem>>, vector<1x1x8x32xf32>
    %33 = vector.shape_cast %32 : vector<1x1x8x32xf32> to vector<8x32xf32>
    %cst_25 = arith.constant dense<0.000000e+00> : vector<8x32xf32>
    %34 = tpu.matmul %28, %33, %cst_25 {dimension_numbers = #tpu.dot_dimension_numbers<[1], [0], [0], [1], [0, 0, 1, 1], [], []>} : vector<8x8xf32>, vector<8x32xf32>, vector<8x32xf32> -> vector<8x32xf32>
    %c0_26 = arith.constant 0 : index
    %c0_27 = arith.constant 0 : index
    %c0_28 = arith.constant 0 : index
    %c0_29 = arith.constant 0 : index
    %35 = vector.load %arg7[%c0_26, %c0_27, %c0_28, %c0_29] : memref<1x1x8x32xf32, #tpu.memory_space<vmem>>, vector<1x1x8x32xf32>
    %36 = vector.shape_cast %35 : vector<1x1x8x32xf32> to vector<8x32xf32>
    %37 = vector.shape_cast %34 : vector<8x32xf32> to vector<1x1x8x32xf32>
    tpu.vector_store %arg7[%c0_26, %c0_27, %c0_28, %c0_29], %37 {strides = array<i32>} : memref<1x1x8x32xf32, #tpu.memory_space<vmem>>, vector<1x1x8x32xf32>,
    %38 = arith.index_cast %1 : i32 to index
    %c0_30 = arith.constant 0 : index
    %c0_31 = arith.constant 0 : index
    %39 = vector.load %arg10[%38, %c0_30, %c0_31] : memref<1x8x32xf32, #tpu.memory_space<vmem>>, vector<1x8x32xf32>
    %40 = vector.shape_cast %39 : vector<1x8x32xf32> to vector<8x32xf32>
    %41 = vector.shape_cast %34 : vector<8x32xf32> to vector<1x8x32xf32>
    tpu.vector_store %arg10[%38, %c0_30, %c0_31], %41 {strides = array<i32>} : memref<1x8x32xf32, #tpu.memory_space<vmem>>, vector<1x8x32xf32>,
    return
  }
  func.func @transform_0(%arg0: i32, %arg1: i32, %arg2: i32, %arg3: i32) -> (i32, i32, i32, i32) {
    %c1_i32 = arith.constant 1 : i32
    %0 = arith.muli %arg1, %c1_i32 : i32
    %1 = arith.addi %0, %arg3 : i32
    %c0_i32 = arith.constant 0 : i32
    %c0_i32_0 = arith.constant 0 : i32
    return %arg0, %arg2, %1, %c0_i32 : i32, i32, i32, i32
  }
  func.func @transform_1(%arg0: i32, %arg1: i32, %arg2: i32, %arg3: i32) -> (i32, i32, i32, i32) {
    %c0_i32 = arith.constant 0 : i32
    %c0_i32_0 = arith.constant 0 : i32
    %c0_i32_1 = arith.constant 0 : i32
    return %arg0, %arg2, %c0_i32, %c0_i32_0 : i32, i32, i32, i32
  }
  func.func @transform_2(%arg0: i32, %arg1: i32, %arg2: i32, %arg3: i32) -> (i32, i32, i32, i32) {
    %c0_i32 = arith.constant 0 : i32
    %c0_i32_0 = arith.constant 0 : i32
    %c0_i32_1 = arith.constant 0 : i32
    return %arg0, %arg2, %c0_i32, %c0_i32_0 : i32, i32, i32, i32
  }
  func.func @transform_3(%arg0: i32, %arg1: i32, %arg2: i32, %arg3: i32) -> (i32, i32, i32, i32) {
    %c1_i32 = arith.constant 1 : i32
    %0 = arith.muli %arg1, %c1_i32 : i32
    %1 = arith.addi %0, %arg3 : i32
    %c0_i32 = arith.constant 0 : i32
    %c0_i32_0 = arith.constant 0 : i32
    return %arg0, %arg2, %1, %c0_i32 : i32, i32, i32, i32
  }
  func.func @transform_4(%arg0: i32, %arg1: i32, %arg2: i32, %arg3: i32) -> (i32, i32, i32, i32) {
    %c1_i32 = arith.constant 1 : i32
    %0 = arith.muli %arg1, %c1_i32 : i32
    %1 = arith.addi %0, %arg3 : i32
    %c0_i32 = arith.constant 0 : i32
    %c0_i32_0 = arith.constant 0 : i32
    return %arg0, %arg2, %1, %c0_i32 : i32, i32, i32, i32
  }
  func.func @transform_5(%arg0: i32, %arg1: i32, %arg2: i32, %arg3: i32) -> (i32, i32, i32, i32) {
    %c1_i32 = arith.constant 1 : i32
    %0 = arith.muli %arg1, %c1_i32 : i32
    %1 = arith.addi %0, %arg3 : i32
    %c0_i32 = arith.constant 0 : i32
    %c0_i32_0 = arith.constant 0 : i32
    return %arg0, %arg2, %1, %c0_i32 : i32, i32, i32, i32
  }
}

</mosaic_0001>

<bundles_post_ra>
// kernel: tpu_custom_call.1
= control target key start
LH: loop header
LB: loop body
LE: loop exit
PB: predicated region body
PF: predicated region fallthrough
CT: control target
= control target key end

     0   :  { %s1677_s0 = inlined_call_operand.hbm [shape: f32[2,4,8,32], index: 0, kind: input, shape index: {}]   ;;  %s1678_s1 = inlined_call_operand.hbm [shape: f32[2,4,8,32], index: 1, kind: input, shape index: {}]   ;;  %s1679_s2 = inlined_call_operand.hbm [shape: f32[2,4,8,32], index: 2, kind: input, shape index: {}]   ;;  %s1680_s3 = inlined_call_operand.hbm [shape: f32[2,4,8,32], index: 3, kind: output, shape index: {0}]   ;;  %s1681_s4 = inlined_call_operand.hbm [shape: f32[2,4,8,8], index: 4, kind: output, shape index: {1}]   ;;  %s1682_s5 = inlined_call_operand.hbm [shape: f32[2,4,8,8], index: 5, kind: output, shape index: {2}]  }
   0x1   :  { %1696 = sst [smem:[#allocation25_spill]] %s1678_s1 }
   0x2   :  { %11 = vsyncpa [#allocation4], 0 }
   0x3   :  { %13 = vsyncpa [#allocation4 + $0x1], 0 }
   0x4   :  { %14 = vsyncpa [#allocation7], 0 }
   0x5   :  { %16 = vsyncpa [#allocation7 + $0x1], 0 }
   0x6   :  { %17 = vsyncpa [#allocation5], 0 }
   0x7   :  { %19 = vsyncpa [#allocation5 + $0x1], 0 }
   0x8   :  { %20 = vsyncpa [#allocation11], 0 }
   0x9   :  { %22 = vsyncpa [#allocation11 + $0x1], 0  ;;  %s1304_s18 = smov 0   ;;  %s1306_s19 = smov 0  }
   0xa   :  { %s1308_s20 = smov 0   ;;  %s1310_s21 = smov 0  }
   0xb   :  { %s1312_s22 = smov 0   ;;  %s1314_s23 = smov 0  }
   0xc   :  { %s1316_s24 = smov 0   ;;  %s1318_s25 = smov 0  }
   0xd LB: > { %1697 = sst [smem:[#allocation17_spill]] %s1235_s18  ;;  %s1345_s26 = sadd.s32 4294967295, %s1263_s25   ;;  %s1263_s25 = sphi %s1318_s25, %s28_s25   ;;  %s1259_s24 = sphi %s1316_s24, %s1729_s24   ;;  %s1255_s23 = sphi %s1314_s23, %s1728_s23   ;;  %s1251_s22 = sphi %s1312_s22, %s1727_s22   ;;  %s1247_s21 = sphi %s1310_s21, %s1726_s21   ;;  %s1243_s20 = sphi %s1308_s20, %s1732_s20   ;;  %s1239_s19 = sphi %s1306_s19, %s1731_s19   ;;  %s1235_s18 = sphi %s1304_s18, %s1730_s18  }
   0xe   : > { %1698 = sst [smem:[#allocation18_spill]] %s1255_s23  ;;  %s1683_s27 = sadd.s32 4294967294, %s1263_s25  }
   0xf   : > { %1699 = sst [smem:[#allocation19_spill]] %s1259_s24  ;;  %s46_s28 = sadd.s32 1, %s1255_s23 }
  0x10   : > { %1700 = sst [smem:[#allocation20_spill]] %s1263_s25  ;;  %s54_s29 = sadd.s32 1, %s1259_s24 }
  0x11   : > { %p48_p0 = scmp.ge.s32.totalorder %s46_s28, 4  ;;  %s67_s30 = sadd.s32 1, %s1243_s20 }
  0x12   : > { %p74_p1 = scmp.ne.s32.totalorder %s1243_s20, %s1239_s19  ;;  %p75_p2 = scmp.eq.s32.totalorder %s1263_s25, 0 }
  0x13   : > { %s1734_s28 = smov (%p48_p0, %s46_s28), 0  ;;  %s1736_s29 = smov (!%p48_p0, %s54_s29), %s1259_s24 }
  0x14   : > { %1701 = sst [smem:[#allocation21_spill]] %s1734_s28  ;;  %s61_s6 = ssub.s32 %s1255_s23, %s1734_s28 }
  0x15   : > { %p1359_p3 = por %p75_p2, %p74_p1  ;;  %p56_p4 = scmp.ge.s32.totalorder %s1736_s29, 2 }
  0x16   : > { %p80_p5 = scmp.ne.s32.totalorder %s1239_s19, %s1235_s18  ;;  %p81_p6 = scmp.eq.s32.totalorder %s1345_s26, 0 }
  0x17   : > { %p166_p7 = scmp.eq.s32.totalorder %s1345_s26, 7  ;;  %s1738_s29 = smov (%p56_p4, %s1736_s29), 0 }
  0x18   : > { %1703 = sst [smem:[#allocation22_spill]] %s1738_s29  ;;  %p1369_p8 = por %p81_p6, %p80_p5 }
  0x19   : > { %p1373_p9 = por %p166_p7, %p74_p1  ;;  %s60_s10 = ssub.s32 %s1259_s24, %s1738_s29 }
  0x1a   : > { %s1704_s8 = scalar_select %p1369_p8, 1, 0 }
  0x1b   : > { %s1705_s9 = scalar_select %p1373_p9, 1, 0 }
  0x1c   : > { %p172_p10 = scmp.eq.s32.totalorder %s1683_s27, 7  ;;  %s62_s11 = sor.u32 %s61_s6, %s60_s10 }
  0x1d   : > { %p65_p11 = scmp.eq.s32.totalorder %s62_s11, 0  ;;  %p938_p13 = scmp.lt.s32.totalorder %s1263_s25, 8 }
  0x1e   : > { %p1381_p12 = por %p172_p10, %p80_p5  ;;  %s1685_s13 = sand.u32 1, %s1243_s20  }
  0x1f   : > { %s1388_s14 = scalar_select %p65_p11, %s1243_s20, %s67_s30  }
  0x20   : > { %s1706_s12 = scalar_select %p1381_p12, 1, 0 }
  0x21   : > { %1708 = sst [smem:[#allocation24_spill]] %s1388_s14  ;;  %s1392_s15 = sshll.u32 %s1685_s13, 3 }
  0x22   : > { %1707 = sst [smem:[#allocation23_spill]] %s1706_s12  ;;  %s862_s16 = sshll.u32 %s1259_s24, 2 }
  0x23   : > { %s267_s17 = sadd.s32 %s1255_s23, %s862_s16  ;;  %p1398_p0 = pnand %p938_p13, %p1359_p3 }
  0x24   : > { %s1402_s6 = sshll.u32 %s267_s17, 7  ;;  %s278_s10 = sand.u32 1, %s1263_s25  }
  0x25   : > { %s1709_s27 = scalar_select %p1398_p0, 1, 0 }
  0x26   : > { %s1710_s1 = sld [smem:[#allocation25_spill]]  ;;  %s282_s16 = scalar_lea.vmem [#allocation6], %s1392_s15 }
  0x27   : > { %s291_s7 = sshll.u32 %s282_s16, 4  ;;  %s1416_s13 = scalar_lea.sflag [#allocation7], %s278_s10  ;;  %s1413_s7 = int_to_ptr.vmem [resolvable:$true] %s291_s7 }
  0x28   : > { %p1422_p4 = pneg %p1398_p0 }
  0x2c   : > { %s1409_s30 = scalar_lea.hbm %s1710_s1, %s1402_s6  ;;  %s1016_s16 = scalar_lea.hbm %s1710_s1, 1024 }
  0x2d   : > { %s1011_s17 = scalar_lea.hbm %s1409_s30, 128  ;;  %p1017_p7 = scmp.lt.u32.totalorder %s1409_s30, %s1710_s1 }
  0x2e   : > { %p1012_p3 = scmp.ne.s32.totalorder %s1409_s30, %s1011_s17  ;;  %p1018_p10 = scmp.lt.u32.totalorder %s1016_s16, %s1011_s17 }
  0x2f   : > { %p1020_p13 = scmp.lt.u32.totalorder %s1011_s17, %s1409_s30 }
  0x30   : > { %p1014_p5 = pnand %p1422_p4, %p1012_p3  ;;  %p1019_p11 = por %p1018_p10, %p1017_p7 }
  0x32   : > { %p1015_p6 = pneg %p1014_p5  ;;  %p1021_p1 = por %p1020_p13, %p1019_p11 }
  0x34   : > { %p1022_p2 = pnand %p1021_p1, %p1015_p6 }
  0x36   : > { %1025 = shalt.err (!%p1022_p2)
}
  0x37   : > { %s1026_s10 = scalar_lea.vmem %s1413_s7, 128  ;;  %s1265_s29 = smov [#allocation6]  }
  0x38   : > { %p1027_p3 = scmp.ne.s32.totalorder %s1413_s7, %s1026_s10  ;;  %s1031_s11 = sshll.u32 %s1265_s29, 4  ;;  %s1032_s11 = int_to_ptr.vmem [resolvable:$false] %s1031_s11 }
  0x39   : > { %s1033_s23 = scalar_lea.vmem %s1032_s11, 256  ;;  %p1034_p9 = scmp.lt.s32.totalorder %s1413_s7, %s1032_s11 }
  0x3a   : > { %p1029_p5 = pnand %p1027_p3, %p1422_p4  ;;  %p1035_p8 = scmp.lt.s32.totalorder %s1033_s23, %s1026_s10 }
  0x3c   : > { %p1030_p12 = pneg %p1029_p5  ;;  %p1036_p7 = por %p1035_p8, %p1034_p9 }
  0x3e   : > { %p1037_p10 = pnand %p1036_p7, %p1030_p12 }
  0x40   : > { %1040 = shalt.err (!%p1037_p10)
}
  0x41   : > { %924 = dma.hbm_to_vmem [thread:$0]  (!%p1398_p0), %s1409_s30, 128, %s1413_s7, %s1416_s13  }
  0x42   : > { %p1712_p1 = scmp.lt.s32.totalorder %s1263_s25, 9  ;;  %p1713_p2 = scmp.ge.s32.totalorder %s1263_s25, 1 }
  0x43   : > { %s1458_s10 = scalar_lea.hbm %s1677_s0, %s1402_s6  ;;  %s260_s29 = scalar_lea.vmem [#allocation3], %s1392_s15 }
  0x44   : > { %p1450_p6 = pnand %p1713_p2, %p1712_p1  ;;  %s271_s11 = sshll.u32 %s260_s29, 4  ;;  %s1461_s11 = int_to_ptr.vmem [resolvable:$true] %s271_s11 }
  0x45   : > { %s1467_s23 = scalar_lea.hbm %s1679_s2, %s1402_s6  ;;  %s1715_s1 = sand.u32 1, %s1243_s20  }
  0x46   : > { %s1714_s24 = scalar_select %p1450_p6, 1, 0 }
  0x47   : > { %s257_s14 = scalar_lea.sflag [#allocation4], %s1715_s1  ;;  %s1041_s12 = scalar_lea.hbm %s1458_s10, 128 }
  0x48   : > { %p1042_p8 = scmp.ne.s32.totalorder %s1458_s10, %s1041_s12  ;;  %s1046_s18 = scalar_lea.hbm %s1677_s0, 1024 }
  0x49   : > { %p1047_p11 = scmp.lt.u32.totalorder %s1458_s10, %s1677_s0  ;;  %p1048_p13 = scmp.lt.u32.totalorder %s1046_s18, %s1041_s12 }
  0x4a   : > { %p1044_p9 = pnand %p1042_p8, %p1422_p4  ;;  %p1050_p5 = scmp.lt.u32.totalorder %s1041_s12, %s1458_s10 }
  0x4b   : > { %p1049_p3 = por %p1048_p13, %p1047_p11 }
  0x4c   : > { %p1045_p12 = pneg %p1044_p9 }
  0x4d   : > { %p1051_p7 = por %p1050_p5, %p1049_p3 }
  0x4f   : > { %p1052_p10 = pnand %p1051_p7, %p1045_p12 }
  0x51   : > { %1055 = shalt.err (!%p1052_p10)
}
  0x52   : > { %s1056_s1 = scalar_lea.vmem %s1461_s11, 128  ;;  %s1266_s6 = smov [#allocation3]  }
  0x53   : > { %p1057_p1 = scmp.ne.s32.totalorder %s1461_s11, %s1056_s1  ;;  %s1061_s30 = sshll.u32 %s1266_s6, 4  ;;  %s1062_s30 = int_to_ptr.vmem [resolvable:$false] %s1061_s30 }
  0x54   : > { %s1063_s25 = scalar_lea.vmem %s1062_s30, 256  ;;  %p1064_p9 = scmp.lt.s32.totalorder %s1461_s11, %s1062_s30 }
  0x55   : > { %p1059_p2 = pnand %p1057_p1, %p1422_p4  ;;  %p1065_p6 = scmp.lt.s32.totalorder %s1063_s25, %s1056_s1 }
  0x57   : > { %p1060_p8 = pneg %p1059_p2  ;;  %p1066_p11 = por %p1065_p6, %p1064_p9 }
  0x59   : > { %p1067_p13 = pnand %p1066_p11, %p1060_p8 }
  0x5b   : > { %1070 = shalt.err (!%p1067_p13)
}
  0x5c   : > { %921 = dma.hbm_to_vmem [thread:$0]  (!%p1398_p0), %s1458_s10, 128, %s1461_s11, %s257_s14  }
  0x5d   : > { %s302_s18 = scalar_lea.vmem [#allocation8], %s1392_s15  ;;  %s1071_s7 = scalar_lea.hbm %s1467_s23, 128 }
  0x5e   : > { %s311_s12 = sshll.u32 %s302_s18, 4  ;;  %p1072_p12 = scmp.ne.s32.totalorder %s1467_s23, %s1071_s7  ;;  %s312_s12 = int_to_ptr.vmem [resolvable:$true] %s311_s12 }
  0x5f   : > { %s1076_s29 = scalar_lea.hbm %s1679_s2, 1024  ;;  %p1077_p5 = scmp.lt.u32.totalorder %s1467_s23, %s1679_s2 }
  0x60   : > { %p1074_p6 = pnand %p1072_p12, %p1422_p4  ;;  %p1078_p7 = scmp.lt.u32.totalorder %s1076_s29, %s1071_s7 }
  0x61   : > { %p1080_p1 = scmp.lt.u32.totalorder %s1071_s7, %s1467_s23 }
  0x62   : > { %p1075_p3 = pneg %p1074_p6  ;;  %p1079_p10 = por %p1078_p7, %p1077_p5 }
  0x64   : > { %p1081_p2 = por %p1080_p1, %p1079_p10 }
  0x66   : > { %p1082_p8 = pnand %p1081_p2, %p1075_p3 }
  0x68   : > { %1085 = shalt.err (!%p1082_p8)
}
  0x69   : > { %s1086_s14 = scalar_lea.vmem %s312_s12, 128  ;;  %s1267_s15 = smov [#allocation8]  }
  0x6a   : > { %p1087_p9 = scmp.ne.s32.totalorder %s312_s12, %s1086_s14  ;;  %s1091_s10 = sshll.u32 %s1267_s15, 4  ;;  %s1092_s10 = int_to_ptr.vmem [resolvable:$false] %s1091_s10 }
  0x6b   : > { %s1093_s11 = scalar_lea.vmem %s1092_s10, 256  ;;  %p1094_p12 = scmp.lt.s32.totalorder %s312_s12, %s1092_s10 }
  0x6c   : > { %p1089_p11 = pnand %p1087_p9, %p1422_p4  ;;  %p1095_p6 = scmp.lt.s32.totalorder %s1093_s11, %s1086_s14 }
  0x6e   : > { %p1090_p13 = pneg %p1089_p11  ;;  %p1096_p0 = por %p1095_p6, %p1094_p12 }
  0x70   : > { %p1097_p5 = pnand %p1096_p0, %p1090_p13 }
  0x72   : > { %1100 = shalt.err (!%p1097_p5)
}
  0x73   : > { %p1716_p7 = scmp.ne.s32.totalorder %s1709_s27, 0  ;;  %p1717_p3 = scmp.ne.s32.totalorder %s1714_s24, 0 }
  0x74   : > { %s1514_s28 = sand.u32 (!%p1717_p3), 1, %s1239_s19   ;;  %p1718_p0 = scmp.ne.s32.totalorder (!%p1717_p3), %s1704_s8, 0 }
  0x75   : > { %927 = dma.hbm_to_vmem [thread:$0]  (!%p1716_p7), %s1467_s23, 128, %s312_s12, %s1416_s13  }
  0x76   : > { %320 = sbr.rel (%p1717_p3) target bundleno = 898 (0x382), region = 32  ;;  %s1517_s30 = sshll.u32 (!%p1717_p3), %s1514_s28, 3 }
  0x77   : > { %s323_s25 = scalar_lea.sflag (!%p1717_p3), [#allocation4], %s1514_s28  ;;  %s326_s18 = scalar_lea.vmem (!%p1717_p3), [#allocation3], %s1517_s30 }
  0x7d   : > { %1218 = dma.done.wait (%p1718_p0), %s323_s25, 128  }
  0x7e   : > { %1220 = vsyncadd (%p1718_p0), %s323_s25, 4294967168  ;;  %s331_s27 = sand.u32 1, %s1345_s26   ;;  %s335_s24 = scalar_lea.vmem [#allocation6], %s1517_s30 }
  0x7f   : > { %s332_s13 = scalar_lea.sflag [#allocation7], %s331_s27 }
  0x80   : > { %1222 = dma.done.wait (%p1718_p0), %s332_s13, 256  }
  0x81   : > { %1224 = vsyncadd (%p1718_p0), %s332_s13, 4294967040  ;;  %s344_s23 = scalar_lea.vmem [#allocation8], %s1517_s30  ;;  %s376_s12 = scalar_lea.vmem [#allocation9], %s1517_s30 }
  0x82   : > { %s383_s7 = scalar_lea.vmem [#allocation10], %s1517_s30  ;;  %s390_s17 = scalar_lea.vmem [#allocation12], %s1517_s30 }
  0x83   : > { %p877_p4 = scmp.ne.s32.totalorder %s1247_s21, 0 }
  0x84   : > { %vm402_vm0 = vcmask (!%p877_p4), 261120   ;;  %v1268_v0 = vmov (!%p877_p4), 0.0  }
  0x85   : > { %399 = sbr.rel (%p877_p4) target bundleno = 140 (0x8c), region = 48  ;;  %403 = vst.msk [vmem:[#allocation2] sm:$0xff] (!%p877_p4), %vm402_vm0, %v1268_v0 }
  0x8c PF: > { %v410_v1 = vld [vmem:[%s335_s24] sm:$0xff]  ;;  %vm411_vm1 = vcmask 261120   ;;  %v404_v2 = vld [vmem:[%s326_s18] sm:$0xff]  ;;  %v1269_v4 = vmov 0.0   ;;  %vm1270_vm2 = vmmov 0   ;;  %vm488_vm3 = vcmask 64512  }
  0x8d   : > { %v407_v3 = vld [vmem:[#allocation2] sm:$0xff]  ;;  %896 = vmatprep.subr.mxu0 %v1269_v4  ;;  %898 = vmatprep.mubr.msk.f32.mxu0 %vm1270_vm2, %v1269_v4  ;;  %v502_v15 = vld [vmem:[%s344_s23] sm:$0xff]  ;;  %s884_s8 = sshll.u32 %s1251_s22, 2  ;;  %s623_s1 = sshll.u32 %s383_s7, 4  ;;  %s624_s1 = int_to_ptr.vmem [resolvable:$true] %s623_s1 }
  0x8e   : > { %v408_v5 = vadd.f32 %v407_v3, %v404_v2  ;;  %897 = vmatpush3.xpose.msk.msra.mxu0 %vm411_vm1, %v410_v1  ;;  %901 = vmatprep.subr.mxu1 %v1269_v4  ;;  %s602_s16 = sadd.s32 %s1247_s21, %s884_s8  ;;  %s1565_s10 = scalar_lea.sflag [#allocation11], %s331_s27 }
  0x8f   : > { %903 = vmatprep.mubr.msk.f32.mxu1 %vm1270_vm2, %v1269_v4  ;;  %902 = vmatpush3.msra.mxu1 %v502_v15  ;;  %s1553_s29 = sshll.u32 %s602_s16, 7  ;;  %s1101_s11 = scalar_lea.vmem %s624_s1, 128 }
  0x90   : > { %v409_v6 = vmul.f32 0.17677669, %v408_v5  ;;  %s1561_s15 = scalar_lea.hbm %s1681_s4, %s1553_s29  ;;  %p1102_p10 = scmp.ne.s32.totalorder %s624_s1, %s1101_s11 }
  0x91   : > { %p1719_p1 = scmp.ne.s32.totalorder %s1705_s9, 0  ;;  %s1271_s21 = smov [#allocation10]  }
  0x92   : > { %899 = vmatmul.mubr.msk.f32.vlgmr.msra.gmra.mrb[0].mxu0 %vm411_vm1, %v409_v6  ;;  %s1105_s22 = sshll.u32 %s1271_s21, 4  ;;  %s1106_s22 = int_to_ptr.vmem [resolvable:$false] %s1105_s22 }
  0x93   : > { %p1103_p2 = pnand %p1102_p10, %p1719_p1  ;;  %s1107_s25 = scalar_lea.vmem %s1106_s22, 256 }
  0x94   : > { %p1108_p9 = scmp.lt.s32.totalorder %s624_s1, %s1106_s22  ;;  %p1109_p11 = scmp.lt.s32.totalorder %s1107_s25, %s1101_s11 }
  0x95   : > { %p1104_p8 = pneg %p1103_p2 }
  0x96   : > { %p1110_p13 = por %p1109_p11, %p1108_p9 }
  0x98   : > { %p1111_p12 = pnand %p1110_p13, %p1104_p8 }
 0x165   : > { %v484_v7 = vpop.f32.mrb[0].mxu0 }
 0x166   : > { %v900_v8 = vpop.f32.mrb[1].mxu0  ;;  %v490_v9 = vsel %vm488_vm3, %v484_v7, -inf  ;;  %489 = vst.msk [vmem:[%s383_s7] sm:$0xff] %vm488_vm3, %v484_v7 }
 0x167   : > { %491 = vmax.xlane.f32.xlu0 %v490_v9 }
 0x1f4   : > { %v492_v10 = vpop.xlane.xlu0 %491 }
 0x1f5   : > { %v493_v11 = vsub.f32 %v484_v7, %v492_v10 }
 0x1f7   : > { %v494_v12 = vmul.f32 1.442695, %v493_v11 }
 0x1f9   : > { %1007 = vpow2.f32 %v494_v12 }
 0x203   : > { %v1008_v13 = vpop.eup %1007 }
 0x204   : > { %v496_v14 = vsel %vm488_vm3, %v1008_v13, 0.0 }
 0x205   : > { %497 = vadd.xlane.f32.xlu0 %v496_v14 }
 0x292   : > { %v498_v16 = vpop.xlane.xlu0 %497 }
 0x293   : > { %1009 = vrcp.f32 %v498_v16 }
 0x29d   : > { %v1010_v17 = vpop.eup %1009 }
 0x29e   : > { %v500_v18 = vmul.f32 %v1010_v17, %v1008_v13 }
 0x2a0   : > { %904 = vmatmul.mubr.msk.f32.vlgmr.msra.gmra.mrb[0].mxu1 %vm488_vm3, %v500_v18  ;;  %501 = vst.msk [vmem:[%s390_s17] sm:$0xff] %vm488_vm3, %v500_v18 }
 0x2a1   : > { %1114 = shalt.err (!%p1111_p12)
}
 0x2a2   : > { %s1115_s26 = scalar_lea.hbm %s1561_s15, 128  ;;  %s1119_s13 = scalar_lea.hbm %s1681_s4, 1024 }
 0x2a3   : > { %p1116_p6 = scmp.ne.s32.totalorder %s1561_s15, %s1115_s26  ;;  %p1120_p3 = scmp.lt.u32.totalorder %s1561_s15, %s1681_s4 }
 0x2a4   : > { %p1121_p0 = scmp.lt.u32.totalorder %s1119_s13, %s1115_s26  ;;  %p1123_p10 = scmp.lt.u32.totalorder %s1115_s26, %s1561_s15 }
 0x2a5   : > { %p1117_p5 = pnand %p1116_p6, %p1719_p1 }
 0x2a6   : > { %p1122_p4 = por %p1121_p0, %p1120_p3 }
 0x2a7   : > { %p1118_p7 = pneg %p1117_p5 }
 0x2a8   : > { %p1124_p2 = por %p1123_p10, %p1122_p4 }
 0x2aa   : > { %p1125_p8 = pnand %p1124_p2, %p1118_p7 }
 0x2ac   : > { %1128 = shalt.err (!%p1125_p8)
}
 0x2ad   : > { %913 = dma.vmem_to_hbm [thread:$0]  (%p1719_p1), %s624_s1, 128, %s1561_s15, %s1565_s10  }
 0x2ae   : > { %s1589_s16 = scalar_lea.hbm %s1682_s5, %s1553_s29  ;;  %s640_s6 = sshll.u32 %s390_s17, 4  ;;  %s641_s6 = int_to_ptr.vmem [resolvable:$true] %s640_s6 }
 0x2af   : > { %s1129_s14 = scalar_lea.vmem %s641_s6, 128  ;;  %s1272_s11 = smov [#allocation12]  }
 0x2b0   : > { %p1130_p9 = scmp.ne.s32.totalorder %s641_s6, %s1129_s14  ;;  %s1133_s21 = sshll.u32 %s1272_s11, 4  ;;  %s1134_s21 = int_to_ptr.vmem [resolvable:$false] %s1133_s21 }
 0x2b1   : > { %s1135_s22 = scalar_lea.vmem %s1134_s21, 256  ;;  %p1136_p12 = scmp.lt.s32.totalorder %s641_s6, %s1134_s21 }
 0x2b2   : > { %p1131_p11 = pnand %p1130_p9, %p1719_p1  ;;  %p1137_p6 = scmp.lt.s32.totalorder %s1135_s22, %s1129_s14 }
 0x2b4   : > { %p1132_p13 = pneg %p1131_p11  ;;  %p1138_p5 = por %p1137_p6, %p1136_p12 }
 0x2b6   : > { %p1139_p7 = pnand %p1138_p5, %p1132_p13 }
 0x2b8   : > { %1142 = shalt.err (!%p1139_p7)
}
 0x2b9   : > { %s1143_s17 = scalar_lea.hbm %s1589_s16, 128  ;;  %s1147_s25 = scalar_lea.hbm %s1682_s5, 1024 }
 0x2ba   : > { %p1144_p3 = scmp.ne.s32.totalorder %s1589_s16, %s1143_s17  ;;  %p1148_p10 = scmp.lt.u32.totalorder %s1589_s16, %s1682_s5 }
 0x2bb   : > { %p1149_p2 = scmp.lt.u32.totalorder %s1147_s25, %s1143_s17  ;;  %p1151_p9 = scmp.lt.u32.totalorder %s1143_s17, %s1589_s16 }
 0x2bc   : > { %p1145_p0 = pnand %p1144_p3, %p1719_p1 }
 0x2bd   : > { %p1150_p8 = por %p1149_p2, %p1148_p10 }
 0x2be   : > { %p1146_p4 = pneg %p1145_p0 }
 0x2bf   : > { %p1152_p11 = por %p1151_p9, %p1150_p8 }
 0x2c1   : > { %p1153_p13 = pnand %p1152_p11, %p1146_p4 }
 0x2c3   : > { %1156 = shalt.err (!%p1153_p13)
}
 0x2c4   : > { %914 = dma.vmem_to_hbm [thread:$0]  (%p1719_p1), %s641_s6, 128, %s1589_s16, %s1565_s10  }
 0x2c5   : > { %s606_s27 = sshll.u32 %s376_s12, 4  ;;  %s1617_s23 = scalar_lea.hbm %s1680_s3, %s1553_s29  ;;  %s1619_s27 = int_to_ptr.vmem [resolvable:$true] %s606_s27 }
 0x2c6   : > { %s579_s10 = scalar_lea.sflag [#allocation5], %s1514_s28  ;;  %s1157_s7 = scalar_lea.vmem %s1619_s27, 128 }
 0x2c7   : > { %p1158_p12 = scmp.ne.s32.totalorder %s1619_s27, %s1157_s7  ;;  %s1273_s29 = smov [#allocation9]  }
 0x2c8   : > { %s1161_s8 = sshll.u32 %s1273_s29, 4  ;;  %s1162_s8 = int_to_ptr.vmem [resolvable:$false] %s1161_s8 }
 0x2c9   : > { %p1159_p6 = pnand %p1158_p12, %p1719_p1  ;;  %s1163_s16 = scalar_lea.vmem %s1162_s8, 256 }
 0x2ca   : > { %p1164_p7 = scmp.lt.s32.totalorder %s1619_s27, %s1162_s8  ;;  %p1165_p3 = scmp.lt.s32.totalorder %s1163_s16, %s1157_s7 }
 0x2cb   : > { %p1160_p5 = pneg %p1159_p6 }
 0x2cc   : > { %p1166_p0 = por %p1165_p3, %p1164_p7 }
 0x2ce   : > { %p1167_p4 = pnand %p1166_p0, %p1160_p5 }
 0x373   : > { %v572_v19 = vpop.f32.mrb[0].mxu1 }
 0x374   : > { %576 = vst.msk [vmem:[%s376_s12] sm:$0xff] %vm411_vm1, %v572_v19  ;;  %577 = vst.msk [vmem:[#allocation2] sm:$0xff] %vm411_vm1, %v572_v19  ;;  %v905_v20 = vpop.f32.mrb[1].mxu1 }
 0x375   : > { %1170 = shalt.err (!%p1167_p4)
}
 0x376   : > { %s1171_s28 = scalar_lea.hbm %s1617_s23, 128  ;;  %s1175_s6 = scalar_lea.hbm %s1680_s3, 1024 }
 0x377   : > { %p1172_p10 = scmp.ne.s32.totalorder %s1617_s23, %s1171_s28  ;;  %p1176_p9 = scmp.lt.u32.totalorder %s1617_s23, %s1680_s3 }
 0x378   : > { %p1177_p11 = scmp.lt.u32.totalorder %s1175_s6, %s1171_s28  ;;  %p1179_p12 = scmp.lt.u32.totalorder %s1171_s28, %s1617_s23 }
 0x379   : > { %p1173_p2 = pnand %p1172_p10, %p1719_p1 }
 0x37a   : > { %p1178_p13 = por %p1177_p11, %p1176_p9 }
 0x37b   : > { %p1174_p8 = pneg %p1173_p2 }
 0x37c   : > { %p1180_p6 = por %p1179_p12, %p1178_p13 }
 0x37e   : > { %p1181_p5 = pnand %p1180_p6, %p1174_p8 }
 0x380   : > { %1184 = shalt.err (!%p1181_p5)
}
 0x381   : > { %912 = dma.vmem_to_hbm [thread:$0]  (%p1719_p1), %s1619_s27, 128, %s1617_s23, %s579_s10  }
 0x382 PF: > { %s1720_s21 = sld [smem:[#allocation20_spill]]  ;;  %s1721_s22 = sld [smem:[#allocation17_spill]] }
 0x383   : > { %s1722_s17 = sld [smem:[#allocation23_spill]] }
 0x388   : > { %p939_p7 = scmp.ge.s32.totalorder %s1720_s21, 2  ;;  %s652_s1 = sand.u32 1, %s1721_s22  }
 0x389   : > { %p1723_p3 = scmp.ne.s32.totalorder %s1722_s17, 0  ;;  %s653_s15 = scalar_lea.sflag [#allocation5], %s652_s1 }
 0x38b   : > { %p929_p0 = pnand %p939_p7, %p1723_p3 }
 0x38d   : > { %1226 = dma.done.wait (!%p929_p0), %s653_s15, 128  }
 0x38e   : > { %1228 = vsyncadd (!%p929_p0), %s653_s15, 4294967168  ;;  %s1724_s25 = sadd.s32 4294967294, %s1720_s21  }
 0x38f   : > { %s661_s26 = sand.u32 1, %s1724_s25  }
 0x390   : > { %s662_s18 = scalar_lea.sflag [#allocation11], %s661_s26 }
 0x391   : > { %1230 = dma.done.wait (!%p929_p0), %s662_s18, 256  }
 0x392   : > { %1232 = vsyncadd (!%p929_p0), %s662_s18, 4294967040  ;;  %s28_s25 = sadd.s32 1, %s1720_s21   ;;  %s1725_s9 = sld [smem:[#allocation24_spill]] }
 0x393   : > { %p25_p1 = scmp.ge.s32.totalorder %s28_s25, 10   ;;  %s1726_s21 = sld [smem:[#allocation18_spill]] }
 0x394   : > { %s1727_s22 = sld [smem:[#allocation19_spill]]  ;;  %s1728_s23 = sld [smem:[#allocation21_spill]] }
 0x395   : > { %s1729_s24 = sld [smem:[#allocation22_spill]]  ;;  %s1730_s18 = smov %s1239_s19 }
 0x396   : > { %s1731_s19 = smov %s1243_s20  ;;  %27 = sbr.rel (!%p25_p1) target bundleno = 13 (0xd), region = 139 }
 0x398   : > { %s1732_s20 = smov %s1725_s9 }
 0x39d   :  { %676 = vsyncpa [#allocation4], 1 }
 0x39e   :  { %678 = vsyncpa [#allocation4 + $0x1], 1 }
 0x39f   :  { %679 = vsyncpa [#allocation7], 1 }
 0x3a0   :  { %681 = vsyncpa [#allocation7 + $0x1], 1 }
 0x3a1   :  { %682 = vsyncpa [#allocation5], 1 }
 0x3a2   :  { %684 = vsyncpa [#allocation5 + $0x1], 1 }
 0x3a3   :  { %685 = vsyncpa [#allocation11], 1 }
 0x3a4   :  { %687 = vsyncpa [#allocation11 + $0x1], 1 }

</bundles_post_ra>
